<compile_context>
chip_gen: v5e
topology: v5e:2x2
jax: 0.10.0
libtpu: 0.0.40
codegen_flags: <defaults>
</compile_context>

<pallas_src>
import functools

import jax
import jax.numpy as jnp
from jax.experimental import pallas as pl
from jax.experimental.pallas import tpu as pltpu


def _dice_partial_kernel(x_ref, t_ref, inter_ref, union_ref, *,
                         tile_n, tiles_per_split, n_valid, needs_mask):
    i = pl.program_id(0)   # split index ("parallel")
    j = pl.program_id(1)   # batch-tile index within split ("arbitrary")

    # Output blocks are resident across the j axis (index map constant in j);
    # they act as per-split accumulators.  Zero them on the first tile.
    @pl.when(j == 0)
    def _init():
        inter_ref[...] = jnp.zeros(inter_ref.shape, inter_ref.dtype)
        union_ref[...] = jnp.zeros(union_ref.shape, union_ref.dtype)

    x = x_ref[...].astype(jnp.float32)     # (C, T): classes on sublanes, batch on lanes
    t = t_ref[...]                         # (1, T) int32 labels
    C, T = x.shape

    if needs_mask:
        # Ragged final tile: zero out padded batch columns.
        lane = jax.lax.broadcasted_iota(jnp.int32, (1, T), 1)
        col0 = (i * tiles_per_split + j) * tile_n
        valid = (col0 + lane) < n_valid                     # (1, T)
        fmask = valid.astype(jnp.float32)
        x = jnp.where(valid, x, 0.0)                        # keep exp() finite on pad lanes

    # Softmax over the class (sublane) axis.
    m = jnp.max(x, axis=0, keepdims=True)                   # (1, T)
    e = jnp.exp(x - m)                                      # (C, T) on the EUP
    denom = jnp.sum(e, axis=0, keepdims=True)               # (1, T)
    # approx=False keeps the 1e-5 reference tolerance; still avoids a VALU divide.
    p = e * pl.reciprocal(denom, approx=False)              # (C, T)

    # one-hot(targets): sublane class iota vs the lane-dense label row.
    cls = jax.lax.broadcasted_iota(jnp.int32, (C, T), 0)
    one_hot = (cls == t).astype(jnp.float32)                # (C, T)

    if needs_mask:
        p = p * fmask
        one_hot = one_hot * fmask

    # Deferred batch reduction: pure element-wise accumulation per tile.
    inter_ref[...] += p * one_hot
    union_ref[...] += p + one_hot


def dice_loss(inputs, targets, smooth=1.0, *, tile_n=4096, num_splits=2):
    """Dice loss matching the PyTorch DiceLoss module.

    inputs : (N, C) float logits (f32 or bf16); softmax is taken over C.
    targets: (N,)   integer class labels.
    Returns a scalar float32 loss.
    """
    N, C = inputs.shape

    # Lane-dense layout: batch on lanes, classes on sublanes.
    xt = inputs.T                                   # (C, N)
    t2d = targets.astype(jnp.int32).reshape(1, N)   # (1, N)

    # Tile sizing: large lane-dense batch tiles (this kernel is DMA/overhead
    # bound), capped at the 128-rounded batch width.
    n_pad = ((N + 127) // 128) * 128
    tile_n = max(128, min(int(tile_n), n_pad))
    tile_n = ((tile_n + 127) // 128) * 128

    # Conservative VMEM budget (covers v7x's smaller scoped VMEM): inputs are
    # double-buffered and the two resident accumulator blocks counted twice.
    def _vmem_estimate(t):
        return C * t * 4 * 6 + t * 4 * 4
    while tile_n > 128 and _vmem_estimate(tile_n) > 24 * 1024 * 1024:
        tile_n = max(128, (tile_n // 2) // 128 * 128)

    n_tiles = pl.cdiv(N, tile_n)
    num_splits = max(1, int(num_splits))
    while num_splits > 1 and n_tiles % num_splits != 0:
        num_splits -= 1
    tiles_per_split = n_tiles // num_splits
    needs_mask = (n_tiles * tile_n) != N

    kernel = functools.partial(
        _dice_partial_kernel,
        tile_n=tile_n, tiles_per_split=tiles_per_split,
        n_valid=N, needs_mask=needs_mask)

    x_spec = pl.BlockSpec((C, tile_n), lambda i, j: (0, i * tiles_per_split + j))
    t_spec = pl.BlockSpec((1, tile_n), lambda i, j: (0, i * tiles_per_split + j))
    acc_spec = pl.BlockSpec((C, tile_n), lambda i, j: (0, i))   # resident over j

    part_inter, part_union = pl.pallas_call(
        kernel,
        out_shape=(jax.ShapeDtypeStruct((C, num_splits * tile_n), jnp.float32),
                   jax.ShapeDtypeStruct((C, num_splits * tile_n), jnp.float32)),
        grid_spec=pltpu.PrefetchScalarGridSpec(
            num_scalar_prefetch=0,
            grid=(num_splits, tiles_per_split),
            in_specs=[x_spec, t_spec],
            out_specs=(acc_spec, acc_spec),
        ),
        compiler_params=pltpu.CompilerParams(
            dimension_semantics=("parallel", "arbitrary"),
        ),
    )(xt, t2d)

    # Tiny epilogue in plain XLA: cross-lane/split reduce + dice.
    inter = part_inter.sum(axis=1)       # (C,)
    union = part_union.sum(axis=1)       # (C,)
    dice = (2.0 * inter + smooth) / (union + smooth)
    return 1.0 - dice.mean()


def _dice_loss_ref(inputs, targets, smooth=1.0):
    p = jax.nn.softmax(inputs.astype(jnp.float32), axis=1)
    oh = jax.nn.one_hot(targets, inputs.shape[1], dtype=jnp.float32)
    inter = jnp.sum(p * oh, axis=0)
    union = jnp.sum(p, axis=0) + jnp.sum(oh, axis=0)
    dice = (2.0 * inter + smooth) / (union + smooth)
    return 1.0 - jnp.mean(dice)


if __name__ == "__main__":
    key = jax.random.PRNGKey(0)
    k1, k2, k3, k4 = jax.random.split(key, 4)

    # Case 1: ragged batch (not a multiple of the tile) -> exercises the mask path.
    N1, C1 = 300, 8
    x1 = jax.random.normal(k1, (N1, C1), dtype=jnp.float32)
    t1 = jax.random.randint(k2, (N1,), 0, C1, dtype=jnp.int32)
    loss1 = dice_loss(x1, t1, smooth=1.0, tile_n=128, num_splits=2)
    jax.block_until_ready(loss1)
    ref1 = _dice_loss_ref(x1, t1, smooth=1.0)
    assert jnp.allclose(loss1, ref1, atol=1e-5, rtol=1e-5), (loss1, ref1)

    # Case 2: bf16 logits, even tiling -> exercises the 2-way "parallel" split.
    N2, C2 = 512, 16
    x2 = jax.random.normal(k3, (N2, C2), dtype=jnp.float32).astype(jnp.bfloat16)
    t2 = jax.random.randint(k4, (N2,), 0, C2, dtype=jnp.int32)
    loss2 = dice_loss(x2, t2, smooth=1.0, tile_n=128, num_splits=2)
    jax.block_until_ready(loss2)
    ref2 = _dice_loss_ref(x2, t2, smooth=1.0)
    assert jnp.allclose(loss2, ref2, atol=1e-5, rtol=1e-5), (loss2, ref2)

    print("KERNEL_OK")
</pallas_src>

<mosaic_0001>
module attributes {stable_mosaic.version = 11 : i64} {
  func.func @_dice_partial_kernel(%arg0: i32, %arg1: i32, %arg2: memref<8x128xf32, #tpu.memory_space<vmem>>, %arg3: memref<1x128xi32, #tpu.memory_space<vmem>>, %arg4: memref<8x128xf32, #tpu.memory_space<vmem>>, %arg5: memref<8x128xf32, #tpu.memory_space<vmem>>) attributes {dimension_semantics = [#tpu.dimension_semantics<parallel>, #tpu.dimension_semantics<arbitrary>], iteration_bounds = array<i64: 1, 3>, scalar_prefetch = 0 : i64, scratch_operands = 0 : i64, tpu.core_type = #tpu.core_type<tc>, window_params = [{transform_indices = @transform_0, window_bounds = array<i64: 8, 128>}, {transform_indices = @transform_1, window_bounds = array<i64: 1, 128>}, {transform_indices = @transform_2, window_bounds = array<i64: 8, 128>}, {transform_indices = @transform_3, window_bounds = array<i64: 8, 128>}]} {
    %c0_i32 = arith.constant 0 : i32
    %0 = arith.cmpi eq, %arg1, %c0_i32 : i32
    %1 = arith.extui %0 : i1 to i32
    %c0_i32_0 = arith.constant 0 : i32
    %2 = arith.cmpi ne, %1, %c0_i32_0 : i32
    scf.if %2 {
      %cst_14 = arith.constant 0.000000e+00 : f32
      %46 = vector.broadcast %cst_14 : f32 to vector<8x128xf32>
      %c0_15 = arith.constant 0 : index
      %c0_16 = arith.constant 0 : index
      %47 = vector.load %arg4[%c0_15, %c0_16] : memref<8x128xf32, #tpu.memory_space<vmem>>, vector<8x128xf32>
      tpu.vector_store %arg4[%c0_15, %c0_16], %46 {strides = array<i32>} : memref<8x128xf32, #tpu.memory_space<vmem>>, vector<8x128xf32>,
      %cst_17 = arith.constant 0.000000e+00 : f32
      %48 = vector.broadcast %cst_17 : f32 to vector<8x128xf32>
      %c0_18 = arith.constant 0 : index
      %c0_19 = arith.constant 0 : index
      %49 = vector.load %arg5[%c0_18, %c0_19] : memref<8x128xf32, #tpu.memory_space<vmem>>, vector<8x128xf32>
      tpu.vector_store %arg5[%c0_18, %c0_19], %48 {strides = array<i32>} : memref<8x128xf32, #tpu.memory_space<vmem>>, vector<8x128xf32>,
    } else {
    }
    %c0 = arith.constant 0 : index
    %c0_1 = arith.constant 0 : index
    %3 = vector.load %arg2[%c0, %c0_1] : memref<8x128xf32, #tpu.memory_space<vmem>>, vector<8x128xf32>
    %c0_2 = arith.constant 0 : index
    %c0_3 = arith.constant 0 : index
    %4 = vector.load %arg3[%c0_2, %c0_3] : memref<1x128xi32, #tpu.memory_space<vmem>>, vector<1x128xi32>
    %5 = tpu.iota {dimensions = array<i32: 1>} : vector<1x128xi32>
    %c3_i32 = arith.constant 3 : i32
    %6 = arith.muli %arg0, %c3_i32 : i32
    %7 = arith.addi %6, %arg1 : i32
    %c128_i32 = arith.constant 128 : i32
    %8 = arith.muli %7, %c128_i32 : i32
    %9 = vector.broadcast %8 : i32 to vector<1x128xi32>
    %10 = arith.addi %9, %5 : vector<1x128xi32>
    %c300_i32 = arith.constant 300 : i32
    %11 = vector.broadcast %c300_i32 : i32 to vector<1x128xi32>
    %12 = arith.cmpi slt, %10, %11 : vector<1x128xi32>
    %13 = arith.extui %12 : vector<1x128xi1> to vector<1x128xi32>
    %14 = arith.sitofp %13 : vector<1x128xi32> to vector<1x128xf32>
    %cst = arith.constant 0.000000e+00 : f32
    %15 = vector.shape_cast %12 : vector<1x128xi1> to vector<1x128xi1>
    %16 = vector.broadcast %15 : vector<1x128xi1> to vector<8x128xi1>
    %17 = vector.broadcast %cst : f32 to vector<8x128xf32>
    %18 = arith.select %16, %3, %17 : vector<8x128xi1>, vector<8x128xf32>
    %cst_4 = arith.constant dense<0xFF800000> : vector<128xf32>
    %19 = vector.multi_reduction <maximumf>, %18, %cst_4 [0] : vector<8x128xf32> to vector<128xf32>
    %20 = vector.shape_cast %19 : vector<128xf32> to vector<1x128xf32>
    %21 = vector.broadcast %20 : vector<1x128xf32> to vector<8x128xf32>
    %22 = arith.subf %18, %21 : vector<8x128xf32>
    %23 = math.exp %22 : vector<8x128xf32>
    %cst_5 = arith.constant dense<0.000000e+00> : vector<128xf32>
    %24 = vector.multi_reduction <add>, %23, %cst_5 [0] : vector<8x128xf32> to vector<128xf32>
    %25 = vector.shape_cast %24 : vector<128xf32> to vector<1x128xf32>
    %26 = tpu.reciprocal %25 : vector<1x128xf32> -> vector<1x128xf32>
    %27 = vector.broadcast %26 : vector<1x128xf32> to vector<8x128xf32>
    %28 = arith.mulf %23, %27 : vector<8x128xf32>
    %29 = tpu.iota {dimensions = array<i32: 0>} : vector<8x128xi32>
    %30 = vector.broadcast %4 : vector<1x128xi32> to vector<8x128xi32>
    %31 = arith.cmpi eq, %29, %30 : vector<8x128xi32>
    %32 = arith.extui %31 : vector<8x128xi1> to vector<8x128xi32>
    %33 = arith.sitofp %32 : vector<8x128xi32> to vector<8x128xf32>
    %34 = vector.broadcast %14 : vector<1x128xf32> to vector<8x128xf32>
    %35 = arith.mulf %28, %34 : vector<8x128xf32>
    %36 = vector.broadcast %14 : vector<1x128xf32> to vector<8x128xf32>
    %37 = arith.mulf %33, %36 : vector<8x128xf32>
    %c0_6 = arith.constant 0 : index
    %c0_7 = arith.constant 0 : index
    %38 = vector.load %arg4[%c0_6, %c0_7] : memref<8x128xf32, #tpu.memory_space<vmem>>, vector<8x128xf32>
    %39 = arith.mulf %35, %37 : vector<8x128xf32>
    %40 = arith.addf %38, %39 : vector<8x128xf32>
    %c0_8 = arith.constant 0 : index
    %c0_9 = arith.constant 0 : index
    %41 = vector.load %arg4[%c0_8, %c0_9] : memref<8x128xf32, #tpu.memory_space<vmem>>, vector<8x128xf32>
    tpu.vector_store %arg4[%c0_8, %c0_9], %40 {strides = array<i32>} : memref<8x128xf32, #tpu.memory_space<vmem>>, vector<8x128xf32>,
    %c0_10 = arith.constant 0 : index
    %c0_11 = arith.constant 0 : index
    %42 = vector.load %arg5[%c0_10, %c0_11] : memref<8x128xf32, #tpu.memory_space<vmem>>, vector<8x128xf32>
    %43 = arith.addf %35, %37 : vector<8x128xf32>
    %44 = arith.addf %42, %43 : vector<8x128xf32>
    %c0_12 = arith.constant 0 : index
    %c0_13 = arith.constant 0 : index
    %45 = vector.load %arg5[%c0_12, %c0_13] : memref<8x128xf32, #tpu.memory_space<vmem>>, vector<8x128xf32>
    tpu.vector_store %arg5[%c0_12, %c0_13], %44 {strides = array<i32>} : memref<8x128xf32, #tpu.memory_space<vmem>>, vector<8x128xf32>,
    return
  }
  func.func @transform_0(%arg0: i32, %arg1: i32) -> (i32, i32) {
    %c3_i32 = arith.constant 3 : i32
    %0 = arith.muli %arg0, %c3_i32 : i32
    %1 = arith.addi %0, %arg1 : i32
    %c0_i32 = arith.constant 0 : i32
    %c0_i32_0 = arith.constant 0 : i32
    return %c0_i32, %1 : i32, i32
  }
  func.func @transform_1(%arg0: i32, %arg1: i32) -> (i32, i32) {
    %c3_i32 = arith.constant 3 : i32
    %0 = arith.muli %arg0, %c3_i32 : i32
    %1 = arith.addi %0, %arg1 : i32
    %c0_i32 = arith.constant 0 : i32
    %c0_i32_0 = arith.constant 0 : i32
    return %c0_i32, %1 : i32, i32
  }
  func.func @transform_2(%arg0: i32, %arg1: i32) -> (i32, i32) {
    %c0_i32 = arith.constant 0 : i32
    %c0_i32_0 = arith.constant 0 : i32
    return %c0_i32, %arg0 : i32, i32
  }
  func.func @transform_3(%arg0: i32, %arg1: i32) -> (i32, i32) {
    %c0_i32 = arith.constant 0 : i32
    %c0_i32_0 = arith.constant 0 : i32
    return %c0_i32, %arg0 : i32, i32
  }
}

</mosaic_0001>

<bundles_post_ra>
// kernel: tpu_custom_call.1
= control target key start
LH: loop header
LB: loop body
LE: loop exit
PB: predicated region body
PF: predicated region fallthrough
CT: control target
= control target key end

     0   :  { %9 = vsyncpa [#allocation3], 0  ;;  %s868_s0 = inlined_call_operand.hbm [shape: f32[8,300], index: 0, kind: input, shape index: {}]   ;;  %s869_s1 = inlined_call_operand.hbm [shape: s32[1,300], index: 1, kind: input, shape index: {}]   ;;  %s870_s2 = inlined_call_operand.hbm [shape: f32[8,128], index: 2, kind: output, shape index: {0}]   ;;  %s871_s3 = inlined_call_operand.hbm [shape: f32[8,128], index: 3, kind: output, shape index: {1}]  }
   0x1   :  { %11 = vsyncpa [#allocation3 + $0x1], 0 }
   0x2   :  { %12 = vsyncpa [#allocation6], 0 }
   0x3   :  { %14 = vsyncpa [#allocation6 + $0x1], 0 }
   0x4   :  { %15 = vsyncpa [#allocation4], 0 }
   0x5   :  { %16 = vsyncpa [#allocation9], 0  ;;  %s739_s12 = smov 0   ;;  %s741_s13 = smov 0  }
   0x6   :  { %s743_s14 = smov 0   ;;  %s745_s15 = smov 0  }
   0x7   :  { %s747_s16 = smov 0   ;;  %s749_s17 = smov 0  }
   0x8 LB: > { %s437_s18 = sadd.s32 4294967295, %s713_s17   ;;  %s31_s19 = sadd.s32 1, %s709_s16  ;;  %s713_s17 = sphi %s749_s17, %s22_s17   ;;  %s709_s16 = sphi %s747_s16, %s879_s16   ;;  %s705_s15 = sphi %s745_s15, %s878_s15   ;;  %s701_s14 = sphi %s743_s14, %s877_s14   ;;  %s697_s13 = sphi %s741_s13, %s876_s13   ;;  %s693_s12 = sphi %s739_s12, %s875_s12  }
   0x9   : > { %p32_p0 = scmp.ge.s32.totalorder %s31_s19, 3  ;;  %s45_s20 = sadd.s32 1, %s701_s14 }
   0xa   : > { %p52_p1 = scmp.ne.s32.totalorder %s701_s14, %s697_s13  ;;  %p53_p2 = scmp.eq.s32.totalorder %s713_s17, 0 }
   0xb   : > { %s881_s19 = smov (%p32_p0, %s31_s19), 0  ;;  %p58_p4 = scmp.ne.s32.totalorder %s697_s13, %s693_s12 }
   0xc   : > { %p775_p3 = por %p53_p2, %p52_p1  ;;  %s42_s22 = ssub.s32 %s709_s16, %s881_s19 }
   0xd   : > { %p59_p5 = scmp.eq.s32.totalorder %s437_s18, 0  ;;  %p43_p6 = scmp.eq.s32.totalorder %s42_s22, 0 }
   0xe   : > { %p473_p8 = scmp.lt.s32.totalorder %s713_s17, 3  ;;  %s164_s25 = sand.u32 1, %s701_s14  }
   0xf   : > { %p784_p7 = por %p59_p5, %p58_p4  ;;  %s441_s26 = sshll.u32 %s709_s16, 3 }
  0x10   : > { %s790_s24 = scalar_select %p43_p6, %s701_s14, %s45_s20  }
  0x11   : > { %s440_s27 = sshll.u32 %s164_s25, 3  ;;  %s174_s30 = scalar_lea.hbm %s868_s0, %s441_s26 }
  0x12   : > { %s176_s4 = sshll.u32 %s174_s30, 4  ;;  %s168_s5 = scalar_lea.vmem [#allocation2], %s440_s27  ;;  %s177_s4 = int_to_ptr.hbm [resolvable:$true] %s176_s4 }
  0x13   : > { %s178_s6 = sshll.u32 %s168_s5, 4  ;;  %p467_p9 = pnand %p473_p8, %p775_p3  ;;  %s179_s6 = int_to_ptr.vmem [resolvable:$true] %s178_s6 }
  0x14   : > { %p442_p10 = scmp.ge.s32.totalorder %s713_s17, 1  ;;  %p202_p11 = scmp.lt.s32.totalorder %s713_s17, 4 }
  0x15   : > { %s165_s7 = scalar_lea.sflag [#allocation3], %s164_s25  ;;  %s193_s10 = scalar_lea.hbm %s869_s1, %s709_s16 }
  0x16   : > { %469 = dma.hbm_to_vmem [thread:$0]  (!%p467_p9), %s177_s4, 128, %s179_s6, %s165_s7  }
  0x17   : > { %p203_p12 = pnand %p442_p10, %p202_p11  ;;  %s195_s11 = sshll.u32 %s193_s10, 4  ;;  %s196_s11 = int_to_ptr.hbm [resolvable:$true] %s195_s11 }
  0x18   : > { %s188_s12 = scalar_lea.vmem [#allocation5], %s164_s25  ;;  %s186_s22 = scalar_lea.sflag [#allocation6], %s164_s25 }
  0x19   : > { %s197_s20 = sshll.u32 %s188_s12, 4  ;;  %206 = sbr.rel (%p203_p12) target bundleno = 118 (0x76), region = 28  ;;  %s198_s20 = int_to_ptr.vmem [resolvable:$true] %s197_s20 }
  0x1a   : > { %472 = dma.hbm_to_vmem [thread:$0]  (!%p467_p9), %s196_s11, 16, %s198_s20, %s186_s22  }
  0x1b   : > { %s806_s21 = sand.u32 (!%p203_p12), 1, %s697_s13  }
  0x1c   : > { %s443_s26 = sshll.u32 (!%p203_p12), %s806_s21, 3  ;;  %s209_s27 = scalar_lea.sflag (!%p203_p12), [#allocation3], %s806_s21 }
  0x1d   : > { %s212_s28 = scalar_lea.vmem (!%p203_p12), [#allocation2], %s443_s26 }
  0x1e   : > { %676 = dma.done.wait (%p784_p7), %s209_s27, 128  }
  0x1f   : > { %678 = vsyncadd (%p784_p7), %s209_s27, 4294967168  ;;  %s219_s25 = scalar_lea.sflag [#allocation6], %s806_s21  ;;  %s221_s29 = scalar_lea.vmem [#allocation5], %s806_s21 }
  0x20   : > { %680 = dma.done.wait (%p784_p7), %s219_s25, 16  }
  0x21   : > { %682 = vsyncadd (%p784_p7), %s219_s25, 4294967280  ;;  %p444_p13 = scmp.ne.s32.totalorder %s705_s15, 0 }
  0x23   : > { %251 = sbr.rel (%p444_p13) target bundleno = 43 (0x2b), region = 40 }
  0x28   : > { %v715_v0 = vmov 0.0  }
  0x29   : > { %252 = vst [vmem:[#allocation7] sm:$0xff] %v715_v0 }
  0x2a   : > { %253 = vst [vmem:[#allocation8] sm:$0xff] %v715_v0 }
  0x2b PF: > { %v256_v1 = vlaneseq  ;;  %s445_s30 = sshll.u32 %s705_s15, 7  ;;  %v254_v4 = vld [vmem:[%s212_s28] sm:$0xff]  ;;  %v716_v32 = vmov 0.0   ;;  %s717_s15 = smov [#allocation7]  }
  0x2c   : > { %v261_v2 = vstv %s445_s30  ;;  %v530_v25 = vld [vmem:[%s221_s29] ss:$0 sm:$0xff]  ;;  %s322_s23 = sshll.u32 %s717_s15, 4  ;;  %s324_s6 = sshll.u32 %s870_s2, 4  ;;  %s323_s23 = int_to_ptr.vmem [resolvable:$true] %s322_s23  ;;  %s325_s6 = int_to_ptr.hbm [resolvable:$true] %s324_s6 }
  0x2d   : > { %v257_v3 = vand.u32 127, %v256_v1  ;;  %v299_v24 = vshrl.u32 %v256_v1, 7  ;;  %s718_s7 = smov [#allocation8]   ;;  %s338_s11 = sshll.u32 %s871_s3, 4  ;;  %s339_s11 = int_to_ptr.hbm [resolvable:$true] %s338_s11 }
  0x2e   : > { %s336_s8 = sshll.u32 %s718_s7, 4  ;;  %p834_p0 = scmp.eq.s32.totalorder %s437_s18, 2  ;;  %s337_s8 = int_to_ptr.vmem [resolvable:$true] %s336_s8 }
  0x2f   : > { %v262_v5 = vadd.s32 %v261_v2, %v257_v3  ;;  %vm301_vm3 = vcmp.eq.s32.totalorder %v299_v24, %v530_v25 }
  0x30   : > { %v447_v34 = vsel %vm301_vm3, 1.0, %v716_v32  ;;  %v306_v40 = vld [vmem:[#allocation7] sm:$0xff] }
  0x31   : > { %vm263_vm0 = vcmp.lt.s32.totalorder %v262_v5, 300  ;;  %v310_v41 = vld [vmem:[#allocation8] sm:$0xff] }
  0x32   : > { %v267_v6 = vsel %vm263_vm0, %v254_v4, 0.0  ;;  %v446_v33 = vsel %vm263_vm0, 1.0, %v716_v32 }
  0x33   : > { %v268_v7 = vrot.slane %v267_v6, 4  ;;  %v305_v38 = vmul.f32 %v447_v34, %v446_v33 }
  0x35   : > { %v269_v8 = vmax.f32 %v267_v6, %v268_v7 }
  0x37   : > { %v270_v9 = vrot.slane %v269_v8, 2 }
  0x39   : > { %v271_v10 = vmax.f32 %v269_v8, %v270_v9 }
  0x3b   : > { %v272_v11 = vrot.slane %v271_v10, 1 }
  0x3d   : > { %v273_v12 = vmax.f32 %v271_v10, %v272_v11 }
  0x3f   : > { %v274_v13 = vsub.f32 %v267_v6, %v273_v12 }
  0x41   : > { %v275_v14 = vmul.f32 1.442695, %v274_v13 }
  0x43   : > { %531 = vpow2.f32 %v275_v14 }
  0x49   : > { %v532_v15 = vpop.eup %531 }
  0x4a   : > { %v277_v16 = vrot.slane %v532_v15, 4 }
  0x4c   : > { %v278_v17 = vadd.f32 %v532_v15, %v277_v16 }
  0x4e   : > { %v279_v18 = vrot.slane %v278_v17, 2 }
  0x50   : > { %v280_v19 = vadd.f32 %v279_v18, %v278_v17 }
  0x52   : > { %v281_v20 = vrot.slane %v280_v19, 1 }
  0x54   : > { %v282_v21 = vadd.f32 %v281_v20, %v280_v19 }
  0x56   : > { %533 = vrcp.f32 %v282_v21  ;;  %v294_v26 = vand.u32 2147483648, %v282_v21  ;;  %vm288_vm1 = vweird.f32 %v282_v21  ;;  %v292_v28 = vand.u32 2147483647, %v282_v21 }
  0x58   : > { %v295_v30 = vor.u32 1.1754944e-38, %v294_v26  ;;  %vm293_vm5 = vcmp.eq.f32.partialorder %v292_v28, 8.507059e+37 }
  0x5c   : > { %v534_v22 = vpop.eup %533 }
  0x5d   : > { %v284_v23 = vmul.f32 %v534_v22, %v282_v21  ;;  %vm289_vm2 = vweird.f32 %v534_v22 }
  0x5e   : > { %vm290_vm4 = vmor %vm288_vm1, %vm289_vm2 }
  0x5f   : > { %v285_v27 = vsub.f32 1.0, %v284_v23 }
  0x61   : > { %v286_v29 = vmul.f32 %v534_v22, %v285_v27 }
  0x63   : > { %v287_v31 = vadd.f32 %v534_v22, %v286_v29 }
  0x65   : > { %v291_v35 = vsel %vm290_vm4, %v534_v22, %v287_v31 }
  0x66   : > { %v296_v36 = vsel %vm293_vm5, %v295_v30, %v291_v35 }
  0x67   : > { %v297_v37 = vmul.f32 %v532_v15, %v296_v36 }
  0x69   : > { %v304_v39 = vmul.f32 %v446_v33, %v297_v37 }
  0x6b   : > { %v307_v42 = vmul.f32 %v305_v38, %v304_v39  ;;  %v311_v43 = vadd.f32 %v305_v38, %v304_v39 }
  0x6d   : > { %v308_v44 = vadd.f32 %v307_v42, %v306_v40  ;;  %v312_v45 = vadd.f32 %v311_v43, %v310_v41 }
  0x6f   : > { %309 = vst [vmem:[#allocation7] sm:$0xff] %v308_v44 }
  0x70   : > { %313 = vst [vmem:[#allocation8] sm:$0xff] %v312_v45  ;;  %459 = dma.vmem_to_hbm [thread:$0]  (%p834_p0), %s323_s23, 128, %s325_s6, [#allocation4]  }
  0x71   : > { %461 = dma.vmem_to_hbm [thread:$0]  (%p834_p0), %s337_s8, 128, %s339_s11, [#allocation9]  }
  0x72   : > { %684 = dma.done.wait (%p834_p0), [#allocation4], 128  }
  0x73   : > { %686 = vsyncadd (%p834_p0), [#allocation4], 4294967168 }
  0x74   : > { %688 = dma.done.wait (%p834_p0), [#allocation9], 128  }
  0x75   : > { %690 = vsyncadd (%p834_p0), [#allocation9], 4294967168 }
  0x76 PF: > { %s22_s17 = sadd.s32 1, %s713_s17   ;;  %s875_s12 = smov %s697_s13 }
  0x77   : > { %p19_p1 = scmp.ge.s32.totalorder %s22_s17, 5   ;;  %s876_s13 = smov %s701_s14 }
  0x78   : > { %s877_s14 = smov %s790_s24  ;;  %s878_s15 = smov %s709_s16 }
  0x79   : > { %s879_s16 = smov %s881_s19  ;;  %21 = sbr.rel (!%p19_p1) target bundleno = 8 (0x8), region = 92 }
  0x7e   :  { %357 = vsyncpa [#allocation3], 1 }
  0x7f   :  { %359 = vsyncpa [#allocation3 + $0x1], 1 }
  0x80   :  { %360 = vsyncpa [#allocation6], 1 }
  0x81   :  { %362 = vsyncpa [#allocation6 + $0x1], 1 }
  0x82   :  { %363 = vsyncpa [#allocation4], 1 }
  0x83   :  { %365 = vsyncpa [#allocation4 + $0x1], 1 }
  0x84   :  { %366 = vsyncpa [#allocation9], 1 }

</bundles_post_ra>
